<compile_context>
chip_gen: v5e
topology: v5e:2x2
jax: 0.10.0
libtpu: 0.0.40
codegen_flags: <defaults>
</compile_context>

<pallas_src>
import jax
import jax.numpy as jnp
from jax.experimental import pallas as pl
from jax.experimental.pallas import tpu as pltpu

_VMEM_TILE_BUDGET = 36 * 1024 * 1024   # target for the double-buffered working set
_VMEM_LIMIT_CAP = 48 * 1024 * 1024     # stay well inside v7x's 64 MiB physical VMEM


def _round_up(v, m):
    return ((v + m - 1) // m) * m


def _vmem_limit(single_buffer_bytes):
    return int(min(_VMEM_LIMIT_CAP,
                   max(16 * 1024 * 1024,
                       2 * single_buffer_bytes + 8 * 1024 * 1024)))


# ---------------------------------------------------------------------------
# Kernels
# ---------------------------------------------------------------------------

def _spectral_mix_vpu_kernel(xr_ref, xi_ref, wr_ref, wi_ref, or_ref, oi_ref):
    """Small-channel path: lane axis = modes (TM); statically unrolled VPU MAC
    over the (tiny) input-channel contraction."""
    xr = xr_ref[...]               # (B, Cin, TM) f32
    xi = xi_ref[...]
    wr = wr_ref[...]               # (Cin, Cout, TM) f32
    wi = wi_ref[...]
    cin = xr.shape[1]
    acc_r = jnp.zeros(or_ref.shape, jnp.float32)
    acc_i = jnp.zeros(oi_ref.shape, jnp.float32)
    for i in range(cin):           # static unroll; only used for small Cin
        xr_i = xr[:, i:i + 1, :]   # (B, 1, TM)
        xi_i = xi[:, i:i + 1, :]
        wr_i = wr[i][None]         # (1, Cout, TM)
        wi_i = wi[i][None]
        acc_r = acc_r + (xr_i * wr_i - xi_i * wi_i)
        acc_i = acc_i + (xr_i * wi_i + xi_i * wr_i)
    or_ref[...] = acc_r
    oi_ref[...] = acc_i


def _spectral_mix_mxu_kernel(x_ref, w_ref, o_ref):
    """Large-channel path: one bf16 MXU matmul per mode, real/imag stacked on
    the contracted (K) and produced (N) axes; f32 accumulation."""
    o_ref[...] = jnp.einsum("mbk,mkn->mbn", x_ref[...], w_ref[...],
                            preferred_element_type=jnp.float32)


# ---------------------------------------------------------------------------
# Pallas wrappers (tiling over the mode axis)
# ---------------------------------------------------------------------------

def _mix_modes_vpu(x_sel, wr, wi, cout):
    """x_sel: (B, Cin, 2*m1, m2) complex64.  wr/wi: (Cin, Cout, M) f32.
    Returns (B, Cout, 2*m1, m2) complex64."""
    B, cin, m1x2, m2 = x_sel.shape
    M = m1x2 * m2
    xr = jnp.real(x_sel).reshape(B, cin, M).astype(jnp.float32)
    xi = jnp.imag(x_sel).reshape(B, cin, M).astype(jnp.float32)

    # Per-mode (per lane element) VMEM bytes across all blocks (sublane pad -> 8).
    per_tm = 4 * (2 * B * _round_up(cin, 8)
                  + 2 * cin * _round_up(cout, 8)
                  + 2 * B * _round_up(cout, 8))
    tm_max = max(1, _VMEM_TILE_BUDGET // (2 * per_tm))
    if tm_max >= M:
        tm, m_pad = M, M
    else:
        tm_cap = max(128, (tm_max // 128) * 128)
        ntiles = -(-M // tm_cap)
        tm = _round_up(-(-M // ntiles), 128)     # lane-dim tile: multiple of 128
        m_pad = ntiles * tm
    if m_pad != M:
        pad = ((0, 0), (0, 0), (0, m_pad - M))
        xr, xi = jnp.pad(xr, pad), jnp.pad(xi, pad)
        wr, wi = jnp.pad(wr, pad), jnp.pad(wi, pad)

    x_spec = pl.BlockSpec((B, cin, tm), lambda m: (0, 0, m))
    w_spec = pl.BlockSpec((cin, cout, tm), lambda m: (0, 0, m))
    o_spec = pl.BlockSpec((B, cout, tm), lambda m: (0, 0, m))
    out_sds = jax.ShapeDtypeStruct((B, cout, m_pad), jnp.float32)
    limit = _vmem_limit(per_tm * _round_up(tm, 128))

    out_r, out_i = pl.pallas_call(
        _spectral_mix_vpu_kernel,
        out_shape=(out_sds, out_sds),
        grid=(m_pad // tm,),
        in_specs=[x_spec, x_spec, w_spec, w_spec],
        out_specs=(o_spec, o_spec),
        compiler_params=pltpu.CompilerParams(
            dimension_semantics=("parallel",),
            vmem_limit_bytes=limit),
    )(xr, xi, wr, wi)

    out = (out_r[:, :, :M] + 1j * out_i[:, :, :M]).astype(jnp.complex64)
    return out.reshape(B, cout, m1x2, m2)


def _mix_modes_mxu(x_sel, w_stack, cout):
    """x_sel: (B, Cin, 2*m1, m2) complex64.  w_stack: (M, Kp, Np) bf16 with the
    stacked complex structure.  Returns (B, Cout, 2*m1, m2) complex64."""
    B, cin, m1x2, m2 = x_sel.shape
    M = m1x2 * m2
    kp, np_ = w_stack.shape[1], w_stack.shape[2]
    bp = _round_up(B, 8)

    x_m = jnp.transpose(x_sel.reshape(B, cin, M), (2, 0, 1))      # (M, B, Cin)
    x_stack = jnp.concatenate(
        [jnp.real(x_m), jnp.imag(x_m)], axis=-1).astype(jnp.bfloat16)  # (M, B, 2Cin)
    x_stack = jnp.pad(x_stack, ((0, 0), (0, bp - B), (0, kp - 2 * cin)))

    per_mode = bp * kp * 2 + kp * np_ * 2 + bp * np_ * 4          # bf16 in, f32 out
    tm_max = max(1, _VMEM_TILE_BUDGET // (2 * per_mode))
    if tm_max >= M:
        tm, m_pad = M, M
    else:
        ntiles = -(-M // tm_max)
        tm = -(-M // ntiles)
        m_pad = ntiles * tm
    if m_pad != M:
        x_stack = jnp.pad(x_stack, ((0, m_pad - M), (0, 0), (0, 0)))
        w_stack = jnp.pad(w_stack, ((0, m_pad - M), (0, 0), (0, 0)))

    limit = _vmem_limit(tm * per_mode)
    out = pl.pallas_call(
        _spectral_mix_mxu_kernel,
        out_shape=jax.ShapeDtypeStruct((m_pad, bp, np_), jnp.float32),
        grid=(m_pad // tm,),
        in_specs=[pl.BlockSpec((tm, bp, kp), lambda m: (m, 0, 0)),
                  pl.BlockSpec((tm, kp, np_), lambda m: (m, 0, 0))],
        out_specs=pl.BlockSpec((tm, bp, np_), lambda m: (m, 0, 0)),
        compiler_params=pltpu.CompilerParams(
            dimension_semantics=("parallel",),
            vmem_limit_bytes=limit),
    )(x_stack, w_stack)

    out = out[:M, :B, :]                                          # (M, B, Np)
    out_c = (out[..., :cout] + 1j * out[..., cout:2 * cout]).astype(jnp.complex64)
    return jnp.transpose(out_c, (1, 2, 0)).reshape(B, cout, m1x2, m2)


# ---------------------------------------------------------------------------
# Parameter packing (done once; reused across forward calls)
# ---------------------------------------------------------------------------

def pack_spectral_weights(weights1, weights2, use_mxu=None):
    """weights1/weights2: (Cin, Cout, m1, m2) complex64 parameters."""
    cin, cout, m1, m2 = weights1.shape
    if use_mxu is None:
        use_mxu = min(cin, cout) >= 64
    w_cat = jnp.concatenate([weights1, weights2], axis=2)         # (Cin, Cout, 2*m1, m2)
    M = 2 * m1 * m2
    packed = dict(cin=cin, cout=cout, modes1=m1, modes2=m2)
    if use_mxu:
        w_m = jnp.transpose(w_cat, (2, 3, 0, 1)).reshape(M, cin, cout)
        wr = jnp.real(w_m).astype(jnp.float32)
        wi = jnp.imag(w_m).astype(jnp.float32)
        # Stacked complex product: [xr | xi] @ [[wr, wi], [-wi, wr]] = [out_r | out_i]
        top = jnp.concatenate([wr, wi], axis=-1)
        bot = jnp.concatenate([-wi, wr], axis=-1)
        w_stack = jnp.concatenate([top, bot], axis=1)             # (M, 2Cin, 2Cout)
        kp = _round_up(2 * cin, 128)
        np_ = _round_up(2 * cout, 128)
        w_stack = jnp.pad(w_stack, ((0, 0), (0, kp - 2 * cin), (0, np_ - 2 * cout)))
        packed.update(kind="mxu", w_stack=w_stack.astype(jnp.bfloat16))
    else:
        w_m = w_cat.reshape(cin, cout, M)                         # natural layout (no transpose)
        packed.update(kind="vpu",
                      wr=jnp.real(w_m).astype(jnp.float32),
                      wi=jnp.imag(w_m).astype(jnp.float32))
    return packed


# ---------------------------------------------------------------------------
# Forward pass
# ---------------------------------------------------------------------------

def spectral_conv2d_forward(x, packed, size=None):
    """x: (B, Cin, H, W) float32.  packed: from pack_spectral_weights()."""
    B, cin, H, W = x.shape
    assert cin == packed["cin"], (cin, packed["cin"])
    cout = packed["cout"]
    m1, m2 = packed["modes1"], packed["modes2"]
    out_h, out_w = (H, W) if size is None else (int(size[0]), int(size[1]))
    # Guard: low/high mode blocks must not overlap in the output spectrum.
    assert out_h >= 2 * m1 and out_w // 2 + 1 >= m2, (out_h, out_w, m1, m2)

    # TODO(synk): rfft2 / irfft2 have no Pallas primitive; they stay in plain JAX.
    x_ft = jnp.fft.rfft2(x)                                       # (B, Cin, H, W//2+1)
    x_sel = jnp.concatenate([x_ft[:, :, :m1, :m2],
                             x_ft[:, :, -m1:, :m2]], axis=2)      # (B, Cin, 2*m1, m2)

    if packed["kind"] == "mxu":
        out_sel = _mix_modes_mxu(x_sel, packed["w_stack"], cout)
    else:
        out_sel = _mix_modes_vpu(x_sel, packed["wr"], packed["wi"], cout)

    out_ft = jnp.zeros((B, cout, out_h, out_w // 2 + 1), jnp.complex64)
    out_ft = out_ft.at[:, :, :m1, :m2].set(out_sel[:, :, :m1, :])
    out_ft = out_ft.at[:, :, out_h - m1:, :m2].set(out_sel[:, :, m1:, :])
    return jnp.fft.irfft2(out_ft, s=(out_h, out_w))               # (B, Cout, out_h, out_w)


def _reference_forward(x, weights1, weights2, modes1, modes2):
    """Pure-JAX reference matching the PyTorch module exactly."""
    B, _, H, W = x.shape
    Cout = weights1.shape[1]
    x_ft = jnp.fft.rfft2(x)
    out_ft = jnp.zeros((B, Cout, H, W // 2 + 1), dtype=jnp.complex64)
    out_ft = out_ft.at[:, :, :modes1, :modes2].set(
        jnp.einsum("bixy,ioxy->boxy", x_ft[:, :, :modes1, :modes2], weights1))
    out_ft = out_ft.at[:, :, H - modes1:, :modes2].set(
        jnp.einsum("bixy,ioxy->boxy", x_ft[:, :, -modes1:, :modes2], weights2))
    return jnp.fft.irfft2(out_ft, s=(H, W))


if __name__ == "__main__":
    B, Cin, Cout = 2, 4, 4
    H, W = 16, 16
    modes1, modes2 = 4, 4

    key = jax.random.PRNGKey(0)
    kx, kw1r, kw1i, kw2r, kw2i = jax.random.split(key, 5)

    x = jax.random.normal(kx, (B, Cin, H, W), dtype=jnp.float32)
    scale = 1.0 / (Cin * Cout)
    w_shape = (Cin, Cout, modes1, modes2)
    weights1 = (scale * (jax.random.uniform(kw1r, w_shape)
                         + 1j * jax.random.uniform(kw1i, w_shape))).astype(jnp.complex64)
    weights2 = (scale * (jax.random.uniform(kw2r, w_shape)
                         + 1j * jax.random.uniform(kw2i, w_shape))).astype(jnp.complex64)

    ref = jax.block_until_ready(_reference_forward(x, weights1, weights2, modes1, modes2))

    # Small-channel path: lane-dense VPU kernel, natural layout, f32 (default here).
    packed_vpu = pack_spectral_weights(weights1, weights2, use_mxu=False)
    out_vpu = jax.block_until_ready(spectral_conv2d_forward(x, packed_vpu))
    assert out_vpu.shape == (B, Cout, H, W), out_vpu.shape
    assert jnp.allclose(out_vpu, ref, rtol=1e-4, atol=1e-5), \
        float(jnp.max(jnp.abs(out_vpu - ref)))

    # Large-channel path (forced here for coverage): stacked real/imag single
    # bf16 MXU matmul per mode tile, f32 accumulation (looser tolerance: bf16 inputs).
    packed_mxu = pack_spectral_weights(weights1, weights2, use_mxu=True)
    out_mxu = jax.block_until_ready(spectral_conv2d_forward(x, packed_mxu))
    assert out_mxu.shape == (B, Cout, H, W), out_mxu.shape
    assert jnp.allclose(out_mxu, ref, rtol=2e-2, atol=3e-3), \
        float(jnp.max(jnp.abs(out_mxu - ref)))

    print("KERNEL_OK")
</pallas_src>

<mosaic_0001>
module attributes {stable_mosaic.version = 11 : i64} {
  func.func @_spectral_mix_vpu_kernel(%arg0: i32, %arg1: memref<2x4x32xf32, #tpu.memory_space<vmem>>, %arg2: memref<2x4x32xf32, #tpu.memory_space<vmem>>, %arg3: memref<4x4x32xf32, #tpu.memory_space<vmem>>, %arg4: memref<4x4x32xf32, #tpu.memory_space<vmem>>, %arg5: memref<2x4x32xf32, #tpu.memory_space<vmem>>, %arg6: memref<2x4x32xf32, #tpu.memory_space<vmem>>) attributes {dimension_semantics = [#tpu.dimension_semantics<parallel>], iteration_bounds = array<i64: 1>, scalar_prefetch = 0 : i64, scratch_operands = 0 : i64, tpu.core_type = #tpu.core_type<tc>, window_params = [{transform_indices = @transform_0, window_bounds = array<i64: 2, 4, 32>}, {transform_indices = @transform_1, window_bounds = array<i64: 2, 4, 32>}, {transform_indices = @transform_2, window_bounds = array<i64: 4, 4, 32>}, {transform_indices = @transform_3, window_bounds = array<i64: 4, 4, 32>}, {transform_indices = @transform_4, window_bounds = array<i64: 2, 4, 32>}, {transform_indices = @transform_5, window_bounds = array<i64: 2, 4, 32>}]} {
    %c0 = arith.constant 0 : index
    %c0_0 = arith.constant 0 : index
    %c0_1 = arith.constant 0 : index
    %0 = vector.load %arg1[%c0, %c0_0, %c0_1] : memref<2x4x32xf32, #tpu.memory_space<vmem>>, vector<2x4x32xf32>
    %c0_2 = arith.constant 0 : index
    %c0_3 = arith.constant 0 : index
    %c0_4 = arith.constant 0 : index
    %1 = vector.load %arg2[%c0_2, %c0_3, %c0_4] : memref<2x4x32xf32, #tpu.memory_space<vmem>>, vector<2x4x32xf32>
    %c0_5 = arith.constant 0 : index
    %c0_6 = arith.constant 0 : index
    %c0_7 = arith.constant 0 : index
    %2 = vector.load %arg3[%c0_5, %c0_6, %c0_7] : memref<4x4x32xf32, #tpu.memory_space<vmem>>, vector<4x4x32xf32>
    %c0_8 = arith.constant 0 : index
    %c0_9 = arith.constant 0 : index
    %c0_10 = arith.constant 0 : index
    %3 = vector.load %arg4[%c0_8, %c0_9, %c0_10] : memref<4x4x32xf32, #tpu.memory_space<vmem>>, vector<4x4x32xf32>
    %cst = arith.constant 0.000000e+00 : f32
    %4 = vector.broadcast %cst : f32 to vector<2x4x32xf32>
    %cst_11 = arith.constant 0.000000e+00 : f32
    %5 = vector.broadcast %cst_11 : f32 to vector<2x4x32xf32>
    %6 = vector.extract_strided_slice %0 {offsets = [0, 0, 0], sizes = [2, 1, 32], strides = [1, 1, 1]} : vector<2x4x32xf32> to vector<2x1x32xf32>
    %7 = vector.extract_strided_slice %1 {offsets = [0, 0, 0], sizes = [2, 1, 32], strides = [1, 1, 1]} : vector<2x4x32xf32> to vector<2x1x32xf32>
    %8 = vector.extract_strided_slice %2 {offsets = [0, 0, 0], sizes = [1, 4, 32], strides = [1, 1, 1]} : vector<4x4x32xf32> to vector<1x4x32xf32>
    %9 = vector.shape_cast %8 : vector<1x4x32xf32> to vector<4x32xf32>
    %10 = vector.shape_cast %9 : vector<4x32xf32> to vector<1x4x32xf32>
    %11 = vector.extract_strided_slice %3 {offsets = [0, 0, 0], sizes = [1, 4, 32], strides = [1, 1, 1]} : vector<4x4x32xf32> to vector<1x4x32xf32>
    %12 = vector.shape_cast %11 : vector<1x4x32xf32> to vector<4x32xf32>
    %13 = vector.shape_cast %12 : vector<4x32xf32> to vector<1x4x32xf32>
    %14 = vector.broadcast %6 : vector<2x1x32xf32> to vector<2x4x32xf32>
    %15 = vector.broadcast %10 : vector<1x4x32xf32> to vector<2x4x32xf32>
    %16 = arith.mulf %14, %15 : vector<2x4x32xf32>
    %17 = vector.broadcast %7 : vector<2x1x32xf32> to vector<2x4x32xf32>
    %18 = vector.broadcast %13 : vector<1x4x32xf32> to vector<2x4x32xf32>
    %19 = arith.mulf %17, %18 : vector<2x4x32xf32>
    %20 = arith.subf %16, %19 : vector<2x4x32xf32>
    %21 = arith.addf %4, %20 : vector<2x4x32xf32>
    %22 = vector.broadcast %6 : vector<2x1x32xf32> to vector<2x4x32xf32>
    %23 = vector.broadcast %13 : vector<1x4x32xf32> to vector<2x4x32xf32>
    %24 = arith.mulf %22, %23 : vector<2x4x32xf32>
    %25 = vector.broadcast %7 : vector<2x1x32xf32> to vector<2x4x32xf32>
    %26 = vector.broadcast %10 : vector<1x4x32xf32> to vector<2x4x32xf32>
    %27 = arith.mulf %25, %26 : vector<2x4x32xf32>
    %28 = arith.addf %24, %27 : vector<2x4x32xf32>
    %29 = arith.addf %5, %28 : vector<2x4x32xf32>
    %30 = vector.extract_strided_slice %0 {offsets = [0, 1, 0], sizes = [2, 1, 32], strides = [1, 1, 1]} : vector<2x4x32xf32> to vector<2x1x32xf32>
    %31 = vector.extract_strided_slice %1 {offsets = [0, 1, 0], sizes = [2, 1, 32], strides = [1, 1, 1]} : vector<2x4x32xf32> to vector<2x1x32xf32>
    %32 = vector.extract_strided_slice %2 {offsets = [1, 0, 0], sizes = [1, 4, 32], strides = [1, 1, 1]} : vector<4x4x32xf32> to vector<1x4x32xf32>
    %33 = vector.shape_cast %32 : vector<1x4x32xf32> to vector<4x32xf32>
    %34 = vector.shape_cast %33 : vector<4x32xf32> to vector<1x4x32xf32>
    %35 = vector.extract_strided_slice %3 {offsets = [1, 0, 0], sizes = [1, 4, 32], strides = [1, 1, 1]} : vector<4x4x32xf32> to vector<1x4x32xf32>
    %36 = vector.shape_cast %35 : vector<1x4x32xf32> to vector<4x32xf32>
    %37 = vector.shape_cast %36 : vector<4x32xf32> to vector<1x4x32xf32>
    %38 = vector.broadcast %30 : vector<2x1x32xf32> to vector<2x4x32xf32>
    %39 = vector.broadcast %34 : vector<1x4x32xf32> to vector<2x4x32xf32>
    %40 = arith.mulf %38, %39 : vector<2x4x32xf32>
    %41 = vector.broadcast %31 : vector<2x1x32xf32> to vector<2x4x32xf32>
    %42 = vector.broadcast %37 : vector<1x4x32xf32> to vector<2x4x32xf32>
    %43 = arith.mulf %41, %42 : vector<2x4x32xf32>
    %44 = arith.subf %40, %43 : vector<2x4x32xf32>
    %45 = arith.addf %21, %44 : vector<2x4x32xf32>
    %46 = vector.broadcast %30 : vector<2x1x32xf32> to vector<2x4x32xf32>
    %47 = vector.broadcast %37 : vector<1x4x32xf32> to vector<2x4x32xf32>
    %48 = arith.mulf %46, %47 : vector<2x4x32xf32>
    %49 = vector.broadcast %31 : vector<2x1x32xf32> to vector<2x4x32xf32>
    %50 = vector.broadcast %34 : vector<1x4x32xf32> to vector<2x4x32xf32>
    %51 = arith.mulf %49, %50 : vector<2x4x32xf32>
    %52 = arith.addf %48, %51 : vector<2x4x32xf32>
    %53 = arith.addf %29, %52 : vector<2x4x32xf32>
    %54 = vector.extract_strided_slice %0 {offsets = [0, 2, 0], sizes = [2, 1, 32], strides = [1, 1, 1]} : vector<2x4x32xf32> to vector<2x1x32xf32>
    %55 = vector.extract_strided_slice %1 {offsets = [0, 2, 0], sizes = [2, 1, 32], strides = [1, 1, 1]} : vector<2x4x32xf32> to vector<2x1x32xf32>
    %56 = vector.extract_strided_slice %2 {offsets = [2, 0, 0], sizes = [1, 4, 32], strides = [1, 1, 1]} : vector<4x4x32xf32> to vector<1x4x32xf32>
    %57 = vector.shape_cast %56 : vector<1x4x32xf32> to vector<4x32xf32>
    %58 = vector.shape_cast %57 : vector<4x32xf32> to vector<1x4x32xf32>
    %59 = vector.extract_strided_slice %3 {offsets = [2, 0, 0], sizes = [1, 4, 32], strides = [1, 1, 1]} : vector<4x4x32xf32> to vector<1x4x32xf32>
    %60 = vector.shape_cast %59 : vector<1x4x32xf32> to vector<4x32xf32>
    %61 = vector.shape_cast %60 : vector<4x32xf32> to vector<1x4x32xf32>
    %62 = vector.broadcast %54 : vector<2x1x32xf32> to vector<2x4x32xf32>
    %63 = vector.broadcast %58 : vector<1x4x32xf32> to vector<2x4x32xf32>
    %64 = arith.mulf %62, %63 : vector<2x4x32xf32>
    %65 = vector.broadcast %55 : vector<2x1x32xf32> to vector<2x4x32xf32>
    %66 = vector.broadcast %61 : vector<1x4x32xf32> to vector<2x4x32xf32>
    %67 = arith.mulf %65, %66 : vector<2x4x32xf32>
    %68 = arith.subf %64, %67 : vector<2x4x32xf32>
    %69 = arith.addf %45, %68 : vector<2x4x32xf32>
    %70 = vector.broadcast %54 : vector<2x1x32xf32> to vector<2x4x32xf32>
    %71 = vector.broadcast %61 : vector<1x4x32xf32> to vector<2x4x32xf32>
    %72 = arith.mulf %70, %71 : vector<2x4x32xf32>
    %73 = vector.broadcast %55 : vector<2x1x32xf32> to vector<2x4x32xf32>
    %74 = vector.broadcast %58 : vector<1x4x32xf32> to vector<2x4x32xf32>
    %75 = arith.mulf %73, %74 : vector<2x4x32xf32>
    %76 = arith.addf %72, %75 : vector<2x4x32xf32>
    %77 = arith.addf %53, %76 : vector<2x4x32xf32>
    %78 = vector.extract_strided_slice %0 {offsets = [0, 3, 0], sizes = [2, 1, 32], strides = [1, 1, 1]} : vector<2x4x32xf32> to vector<2x1x32xf32>
    %79 = vector.extract_strided_slice %1 {offsets = [0, 3, 0], sizes = [2, 1, 32], strides = [1, 1, 1]} : vector<2x4x32xf32> to vector<2x1x32xf32>
    %80 = vector.extract_strided_slice %2 {offsets = [3, 0, 0], sizes = [1, 4, 32], strides = [1, 1, 1]} : vector<4x4x32xf32> to vector<1x4x32xf32>
    %81 = vector.shape_cast %80 : vector<1x4x32xf32> to vector<4x32xf32>
    %82 = vector.shape_cast %81 : vector<4x32xf32> to vector<1x4x32xf32>
    %83 = vector.extract_strided_slice %3 {offsets = [3, 0, 0], sizes = [1, 4, 32], strides = [1, 1, 1]} : vector<4x4x32xf32> to vector<1x4x32xf32>
    %84 = vector.shape_cast %83 : vector<1x4x32xf32> to vector<4x32xf32>
    %85 = vector.shape_cast %84 : vector<4x32xf32> to vector<1x4x32xf32>
    %86 = vector.broadcast %78 : vector<2x1x32xf32> to vector<2x4x32xf32>
    %87 = vector.broadcast %82 : vector<1x4x32xf32> to vector<2x4x32xf32>
    %88 = arith.mulf %86, %87 : vector<2x4x32xf32>
    %89 = vector.broadcast %79 : vector<2x1x32xf32> to vector<2x4x32xf32>
    %90 = vector.broadcast %85 : vector<1x4x32xf32> to vector<2x4x32xf32>
    %91 = arith.mulf %89, %90 : vector<2x4x32xf32>
    %92 = arith.subf %88, %91 : vector<2x4x32xf32>
    %93 = arith.addf %69, %92 : vector<2x4x32xf32>
    %94 = vector.broadcast %78 : vector<2x1x32xf32> to vector<2x4x32xf32>
    %95 = vector.broadcast %85 : vector<1x4x32xf32> to vector<2x4x32xf32>
    %96 = arith.mulf %94, %95 : vector<2x4x32xf32>
    %97 = vector.broadcast %79 : vector<2x1x32xf32> to vector<2x4x32xf32>
    %98 = vector.broadcast %82 : vector<1x4x32xf32> to vector<2x4x32xf32>
    %99 = arith.mulf %97, %98 : vector<2x4x32xf32>
    %100 = arith.addf %96, %99 : vector<2x4x32xf32>
    %101 = arith.addf %77, %100 : vector<2x4x32xf32>
    %c0_12 = arith.constant 0 : index
    %c0_13 = arith.constant 0 : index
    %c0_14 = arith.constant 0 : index
    %102 = vector.load %arg5[%c0_12, %c0_13, %c0_14] : memref<2x4x32xf32, #tpu.memory_space<vmem>>, vector<2x4x32xf32>
    tpu.vector_store %arg5[%c0_12, %c0_13, %c0_14], %93 {strides = array<i32>} : memref<2x4x32xf32, #tpu.memory_space<vmem>>, vector<2x4x32xf32>,
    %c0_15 = arith.constant 0 : index
    %c0_16 = arith.constant 0 : index
    %c0_17 = arith.constant 0 : index
    %103 = vector.load %arg6[%c0_15, %c0_16, %c0_17] : memref<2x4x32xf32, #tpu.memory_space<vmem>>, vector<2x4x32xf32>
    tpu.vector_store %arg6[%c0_15, %c0_16, %c0_17], %101 {strides = array<i32>} : memref<2x4x32xf32, #tpu.memory_space<vmem>>, vector<2x4x32xf32>,
    return
  }
  func.func @transform_0(%arg0: i32) -> (i32, i32, i32) {
    %c0_i32 = arith.constant 0 : i32
    %c0_i32_0 = arith.constant 0 : i32
    %c0_i32_1 = arith.constant 0 : i32
    return %c0_i32, %c0_i32_0, %arg0 : i32, i32, i32
  }
  func.func @transform_1(%arg0: i32) -> (i32, i32, i32) {
    %c0_i32 = arith.constant 0 : i32
    %c0_i32_0 = arith.constant 0 : i32
    %c0_i32_1 = arith.constant 0 : i32
    return %c0_i32, %c0_i32_0, %arg0 : i32, i32, i32
  }
  func.func @transform_2(%arg0: i32) -> (i32, i32, i32) {
    %c0_i32 = arith.constant 0 : i32
    %c0_i32_0 = arith.constant 0 : i32
    %c0_i32_1 = arith.constant 0 : i32
    return %c0_i32, %c0_i32_0, %arg0 : i32, i32, i32
  }
  func.func @transform_3(%arg0: i32) -> (i32, i32, i32) {
    %c0_i32 = arith.constant 0 : i32
    %c0_i32_0 = arith.constant 0 : i32
    %c0_i32_1 = arith.constant 0 : i32
    return %c0_i32, %c0_i32_0, %arg0 : i32, i32, i32
  }
  func.func @transform_4(%arg0: i32) -> (i32, i32, i32) {
    %c0_i32 = arith.constant 0 : i32
    %c0_i32_0 = arith.constant 0 : i32
    %c0_i32_1 = arith.constant 0 : i32
    return %c0_i32, %c0_i32_0, %arg0 : i32, i32, i32
  }
  func.func @transform_5(%arg0: i32) -> (i32, i32, i32) {
    %c0_i32 = arith.constant 0 : i32
    %c0_i32_0 = arith.constant 0 : i32
    %c0_i32_1 = arith.constant 0 : i32
    return %c0_i32, %c0_i32_0, %arg0 : i32, i32, i32
  }
}

</mosaic_0001>

<bundles_post_ra>
// kernel: tpu_custom_call.1
= control target key start
LH: loop header
LB: loop body
LE: loop exit
PB: predicated region body
PF: predicated region fallthrough
CT: control target
= control target key end

     0   :  { %11 = vsyncpa [#allocation3], 0  ;;  %s535_s0 = inlined_call_operand.hbm [shape: f32[2,4,32], index: 0, kind: input, shape index: {}]   ;;  %s536_s1 = inlined_call_operand.hbm [shape: f32[2,4,32], index: 1, kind: input, shape index: {}]   ;;  %s537_s2 = inlined_call_operand.hbm [shape: f32[4,4,32], index: 2, kind: input, shape index: {}]   ;;  %s538_s3 = inlined_call_operand.hbm [shape: f32[4,4,32], index: 3, kind: input, shape index: {}]   ;;  %s539_s4 = inlined_call_operand.hbm [shape: f32[2,4,32], index: 4, kind: output, shape index: {0}]   ;;  %s540_s5 = inlined_call_operand.hbm [shape: f32[2,4,32], index: 5, kind: output, shape index: {1}]  }
   0x1   :  { %12 = vsyncpa [#allocation6], 0 }
   0x2   :  { %13 = vsyncpa [#allocation9], 0 }
   0x3   :  { %14 = vsyncpa [#allocation4], 0 }
   0x4   :  { %15 = vsyncpa [#allocation12], 0  ;;  %s33_s20 = sshll.u32 %s536_s1, 4  ;;  %s382_s21 = smov [#allocation5]   ;;  %s34_s20 = int_to_ptr.hbm [resolvable:$true] %s33_s20 }
   0x5   :  { %s35_s22 = sshll.u32 %s382_s21, 4  ;;  %s20_s25 = sshll.u32 %s535_s0, 4  ;;  %s36_s22 = int_to_ptr.vmem [resolvable:$true] %s35_s22  ;;  %s21_s25 = int_to_ptr.hbm [resolvable:$true] %s20_s25 }
   0x6   :  { %s383_s26 = smov 64   ;;  %s384_s27 = smov 4  }
   0x7   :  { %41 = dma.hbm_to_vmem [thread:$0]  %s34_s20, 128, %s36_s22, [#allocation6], %s383_s26, %s383_s26, %s384_s27  }
   0x8   :  { %s385_s28 = smov [#allocation2]   ;;  %s46_s1 = sshll.u32 %s537_s2, 4  ;;  %s47_s1 = int_to_ptr.hbm [resolvable:$true] %s46_s1 }
   0x9   :  { %s22_s29 = sshll.u32 %s385_s28, 4  ;;  %s59_s8 = sshll.u32 %s538_s3, 4  ;;  %s23_s29 = int_to_ptr.vmem [resolvable:$true] %s22_s29  ;;  %s60_s8 = int_to_ptr.hbm [resolvable:$true] %s59_s8 }
   0xa   :  { %28 = dma.hbm_to_vmem [thread:$0]  %s21_s25, 128, %s23_s29, [#allocation3], %s383_s26, %s383_s26, %s384_s27  }
   0xb   :  { %s386_s9 = smov [#allocation7]   ;;  %s387_s11 = smov [#allocation8]  }
   0xc   :  { %s48_s10 = sshll.u32 %s386_s9, 4  ;;  %s61_s2 = sshll.u32 %s387_s11, 4  ;;  %s49_s10 = int_to_ptr.vmem [resolvable:$true] %s48_s10  ;;  %s62_s2 = int_to_ptr.vmem [resolvable:$true] %s61_s2 }
   0xd   :  { %54 = dma.hbm_to_vmem [thread:$0]  %s47_s1, 256, %s49_s10, [#allocation6], %s383_s26, %s383_s26, %s384_s27  }
   0xe   :  { %67 = dma.hbm_to_vmem [thread:$0]  %s60_s8, 256, %s62_s2, [#allocation9], %s383_s26, %s383_s26, %s384_s27  }
   0xf   :  { %372 = dma.done.wait [#allocation3], 128  }
  0x10   :  { %373 = vsyncadd [#allocation3], 4294967168 }
  0x11   :  { %374 = dma.done.wait [#allocation6], 384  }
  0x12   :  { %375 = vsyncadd [#allocation6], 4294966912 }
  0x13   :  { %376 = dma.done.wait [#allocation9], 256  }
  0x14   :  { %377 = vsyncadd [#allocation9], 4294967040  ;;  %v444_v0 = vld [vmem:[#allocation2] sm:$0xf]  ;;  %v446_v1 = vld [vmem:[#allocation5] sm:$0xf] }
  0x15   :  { %v448_v2 = vld [vmem:[#allocation7] sm:$0xf]  ;;  %v450_v3 = vld [vmem:[#allocation7 + $0x4] sm:$0xf]  ;;  %v452_v4 = vld [vmem:[#allocation7 + $0x8] sm:$0xf] }
  0x16   :  { %v454_v5 = vld [vmem:[#allocation7 + $0xc] sm:$0xf]  ;;  %v456_v6 = vld [vmem:[#allocation8] sm:$0xf]  ;;  %v458_v7 = vld [vmem:[#allocation8 + $0x4] sm:$0xf] }
  0x17   :  { %v460_v8 = vld [vmem:[#allocation8 + $0x8] sm:$0xf]  ;;  %v462_v9 = vld [vmem:[#allocation8 + $0xc] sm:$0xf]  ;;  %v96_v10 = vperm.slane %v444_v0, 0  ;;  %v100_v11 = vperm.slane %v446_v1, 0 }
  0x18   :  { %v116_v12 = vperm.slane %v444_v0, 1  ;;  %v120_v13 = vperm.slane %v446_v1, 1  ;;  %v136_v14 = vperm.slane %v444_v0, 2  ;;  %v140_v15 = vperm.slane %v446_v1, 2  ;;  %v472_v18 = vld [vmem:[#allocation2 + $0x4] sm:$0xf] }
  0x19   :  { %v156_v16 = vperm.slane %v444_v0, 3  ;;  %v160_v17 = vperm.slane %v446_v1, 3  ;;  %vm176_vm0 = vcmask 257024   ;;  %v98_v19 = vmul.f32 %v96_v10, %v448_v2  ;;  %v478_v23 = vld [vmem:[#allocation5 + $0x4] sm:$0xf]  ;;  %s388_s3 = smov [#allocation10]  }
  0x1a   :  { %v102_v20 = vmul.f32 %v100_v11, %v456_v6  ;;  %v118_v21 = vmul.f32 %v116_v12, %v450_v3  ;;  %v122_v22 = vmul.f32 %v120_v13, %v458_v7  ;;  %v138_v24 = vmul.f32 %v136_v14, %v452_v4  ;;  %s508_s12 = sshll.u32 %s388_s3, 4  ;;  %s187_s15 = sshll.u32 %s539_s4, 4  ;;  %s186_s12 = int_to_ptr.vmem [resolvable:$true] %s508_s12  ;;  %s188_s15 = int_to_ptr.hbm [resolvable:$true] %s187_s15 }
  0x1b   :  { %v142_v25 = vmul.f32 %v140_v15, %v460_v8  ;;  %v158_v26 = vmul.f32 %v156_v16, %v454_v5  ;;  %v162_v27 = vmul.f32 %v160_v17, %v462_v9  ;;  %v97_v30 = vperm.slane %v472_v18, 0  ;;  %s389_s4 = smov [#allocation11]   ;;  %s200_s19 = sshll.u32 %s540_s5, 4  ;;  %s201_s19 = int_to_ptr.hbm [resolvable:$true] %s200_s19 }
  0x1c   :  { %v104_v28 = vsub.f32 %v98_v19, %v102_v20  ;;  %v124_v29 = vsub.f32 %v118_v21, %v122_v22  ;;  %v101_v31 = vperm.slane %v478_v23, 0  ;;  %v117_v34 = vperm.slane %v472_v18, 1  ;;  %s198_s16 = sshll.u32 %s389_s4, 4  ;;  %s199_s16 = int_to_ptr.vmem [resolvable:$true] %s198_s16 }
  0x1d   :  { %v144_v32 = vsub.f32 %v138_v24, %v142_v25  ;;  %v164_v33 = vsub.f32 %v158_v26, %v162_v27  ;;  %v121_v35 = vperm.slane %v478_v23, 1  ;;  %v99_v37 = vmul.f32 %v97_v30, %v448_v2 }
  0x1e   :  { %v126_v36 = vadd.f32 %v124_v29, %v104_v28  ;;  %v103_v38 = vmul.f32 %v101_v31, %v456_v6  ;;  %v137_v39 = vperm.slane %v472_v18, 2  ;;  %v119_v40 = vmul.f32 %v117_v34, %v450_v3 }
  0x1f   :  { %v123_v41 = vmul.f32 %v121_v35, %v458_v7  ;;  %v141_v42 = vperm.slane %v478_v23, 2  ;;  %v157_v43 = vperm.slane %v472_v18, 3  ;;  %v161_v47 = vperm.slane %v478_v23, 3 }
  0x20   :  { %v146_v44 = vadd.f32 %v144_v32, %v126_v36  ;;  %v105_v45 = vsub.f32 %v99_v37, %v103_v38  ;;  %v139_v46 = vmul.f32 %v137_v39, %v452_v4  ;;  %v108_v51 = vmul.f32 %v96_v10, %v456_v6 }
  0x21   :  { %v125_v48 = vsub.f32 %v119_v40, %v123_v41  ;;  %v143_v49 = vmul.f32 %v141_v42, %v460_v8  ;;  %v159_v50 = vmul.f32 %v157_v43, %v454_v5  ;;  %v163_v53 = vmul.f32 %v161_v47, %v462_v9 }
  0x22   :  { %v166_v52 = vadd.f32 %v164_v33, %v146_v44  ;;  %v110_v54 = vmul.f32 %v100_v11, %v448_v2  ;;  %v128_v55 = vmul.f32 %v116_v12, %v458_v7  ;;  %v130_v58 = vmul.f32 %v120_v13, %v450_v3 }
  0x23   :  { %v127_v56 = vadd.f32 %v125_v48, %v105_v45  ;;  %v145_v57 = vsub.f32 %v139_v46, %v143_v49  ;;  %v148_v59 = vmul.f32 %v136_v14, %v460_v8  ;;  %v165_v60 = vsub.f32 %v159_v50, %v163_v53 }
  0x24   :  { %177 = vst.msk [vmem:[#allocation10] sm:$0xf] %vm176_vm0, %v166_v52  ;;  %v112_v61 = vadd.f32 %v110_v54, %v108_v51  ;;  %v150_v62 = vmul.f32 %v140_v15, %v452_v4  ;;  %v168_v63 = vmul.f32 %v156_v16, %v462_v9  ;;  %v132_v1 = vadd.f32 %v130_v58, %v128_v55 }
  0x25   :  { %v147_v0 = vadd.f32 %v145_v57, %v127_v56  ;;  %v170_v10 = vmul.f32 %v160_v17, %v454_v5  ;;  %v109_v11 = vmul.f32 %v97_v30, %v456_v6  ;;  %v111_v13 = vmul.f32 %v101_v31, %v448_v2 }
  0x26   :  { %v152_v12 = vadd.f32 %v150_v62, %v148_v59  ;;  %v129_v14 = vmul.f32 %v117_v34, %v458_v7  ;;  %v131_v15 = vmul.f32 %v121_v35, %v450_v3  ;;  %v134_v18 = vadd.f32 %v132_v1, %v112_v61 }
  0x27   :  { %v167_v16 = vadd.f32 %v165_v60, %v147_v0  ;;  %v172_v19 = vadd.f32 %v170_v10, %v168_v63  ;;  %v149_v20 = vmul.f32 %v137_v39, %v460_v8  ;;  %v113_v21 = vadd.f32 %v111_v13, %v109_v11 }
  0x28   :  { %v133_v22 = vadd.f32 %v131_v15, %v129_v14  ;;  %v151_v17 = vmul.f32 %v141_v42, %v452_v4  ;;  %v169_v6 = vmul.f32 %v157_v43, %v462_v9  ;;  %v154_v2 = vadd.f32 %v152_v12, %v134_v18 }
  0x29   :  { %178 = vst.msk [vmem:[#allocation10 + $0x4] sm:$0xf] %vm176_vm0, %v167_v16  ;;  %v171_v7 = vmul.f32 %v161_v47, %v454_v5 }
  0x2a   :  { %v135_v23 = vadd.f32 %v133_v22, %v113_v21  ;;  %v153_v3 = vadd.f32 %v151_v17, %v149_v20  ;;  %193 = dma.vmem_to_hbm [thread:$0]  %s186_s12, 128, %s188_s15, [#allocation4], %s383_s26, %s383_s26, %s384_s27   ;;  %v174_v8 = vadd.f32 %v172_v19, %v154_v2 }
  0x2b   :  { %v173_v24 = vadd.f32 %v171_v7, %v169_v6 }
  0x2c   :  { %v155_v4 = vadd.f32 %v153_v3, %v135_v23  ;;  %179 = vst.msk [vmem:[#allocation11] sm:$0xf] %vm176_vm0, %v174_v8 }
  0x2e   :  { %v175_v9 = vadd.f32 %v173_v24, %v155_v4 }
  0x30   :  { %180 = vst.msk [vmem:[#allocation11 + $0x4] sm:$0xf] %vm176_vm0, %v175_v9 }
  0x31   :  { %206 = dma.vmem_to_hbm [thread:$0]  %s199_s16, 128, %s201_s19, [#allocation12], %s383_s26, %s383_s26, %s384_s27  }
  0x32   :  { %378 = dma.done.wait [#allocation4], 128  }
  0x33   :  { %379 = vsyncadd [#allocation4], 4294967168 }
  0x34   :  { %380 = dma.done.wait [#allocation12], 128  }
  0x35   :  { %381 = vsyncadd [#allocation12], 4294967168 }
  0x36   :  { %215 = vsyncpa [#allocation3], 1 }
  0x37   :  { %216 = vsyncpa [#allocation6], 1 }
  0x38   :  { %217 = vsyncpa [#allocation9], 1 }
  0x39   :  { %218 = vsyncpa [#allocation4], 1 }
  0x3a   :  { %219 = vsyncpa [#allocation12], 1 }

</bundles_post_ra>
